<compile_context>
chip_gen: v7x
topology: tpu7x:2x2x1
jax: 0.10.0
libtpu: 0.0.40
codegen_flags: <defaults>
</compile_context>

<pallas_src>
import functools

import jax
import jax.numpy as jnp
from jax import lax
from jax.experimental import pallas as pl
from jax.experimental.pallas import tpu as pltpu

_VMEM_LIMIT = 32 * 1024 * 1024  # explicit, with headroom; safe on v5e/v6e/v7x


# ----------------------------- tiled linear -----------------------------

def _pick_tile(dim, target, align):
    """Largest `align`-multiple <= target that divides dim, else the full dim.

    TODO(synk): for ragged dims that exceed VMEM, switch to a cdiv grid with a
    masked last tile instead of falling back to the full (untiled) dimension.
    """
    if dim <= target:
        return dim
    t = (target // align) * align
    while t >= align:
        if dim % t == 0:
            return t
        t -= align
    return dim


def _linear_kernel(x_ref, w_ref, b_ref, o_ref, acc_ref):
    # x: (tm, tk), w: (tn, tk) [PyTorch Linear layout], b: (1, tn), o: (tm, tn)
    k = pl.program_id(2)

    @pl.when(k == 0)
    def _():
        acc_ref[...] = jnp.zeros_like(acc_ref)

    # Contract last dims of x and w -> (tm, tn); no materialized w.T.
    acc_ref[...] += lax.dot_general(
        x_ref[...], w_ref[...],
        dimension_numbers=(((1,), (1,)), ((), ())),
        preferred_element_type=jnp.float32)

    @pl.when(k == pl.num_programs(2) - 1)
    def _():
        o_ref[...] = (acc_ref[...] + b_ref[...]).astype(o_ref.dtype)


def pallas_linear(x, w, b, *, tm=512, tn=512, tk=512):
    """y = x @ w.T + b. x: (M, K) f32, w: (N, K) f32, b: (N,) f32 -> (M, N)."""
    m, kdim = x.shape
    n = w.shape[0]
    tm = _pick_tile(m, tm, 8)
    tn = _pick_tile(n, tn, 128)
    tk = _pick_tile(kdim, tk, 128)
    grid = (m // tm, n // tn, kdim // tk)
    return pl.pallas_call(
        _linear_kernel,
        out_shape=jax.ShapeDtypeStruct((m, n), jnp.float32),
        grid_spec=pltpu.PrefetchScalarGridSpec(
            num_scalar_prefetch=0,
            grid=grid,
            in_specs=[
                pl.BlockSpec((tm, tk), lambda i, j, kk: (i, kk)),
                pl.BlockSpec((tn, tk), lambda i, j, kk: (j, kk)),
                pl.BlockSpec((1, tn), lambda i, j, kk: (0, j)),
            ],
            out_specs=pl.BlockSpec((tm, tn), lambda i, j, kk: (i, j)),
            scratch_shapes=[pltpu.VMEM((tm, tn), jnp.float32)],
        ),
        compiler_params=pltpu.CompilerParams(
            dimension_semantics=("parallel", "parallel", "arbitrary"),
            vmem_limit_bytes=_VMEM_LIMIT),
    )(x, w, b.reshape(1, n))


# ----------------------------- flash attention -----------------------------

def _flash_attn_kernel(q_ref, k_ref, v_ref, o_ref, m_ref, l_ref, acc_ref, *,
                       scale):
    # q_ref: (1, tq, d), k_ref/v_ref: (1, ts, d), o_ref: (1, tq, d)
    # Grid = (bsz*heads, tgt_tiles, src_tiles); src axis is last ("arbitrary"),
    # so the output block and the scratch carry across src tiles.
    j = pl.program_id(2)

    @pl.when(j == 0)
    def _():
        m_ref[...] = jnp.full_like(m_ref, -jnp.inf)
        l_ref[...] = jnp.zeros_like(l_ref)
        acc_ref[...] = jnp.zeros_like(acc_ref)

    q = q_ref[0] * scale                                    # VPU multiply, free
    # s = q @ k^T  without a materialized transpose.
    s = lax.dot_general(q, k_ref[0], (((1,), (1,)), ((), ())),
                        preferred_element_type=jnp.float32)  # (tq, ts)

    m_prev = m_ref[0]                                        # (tq, 1)
    m_new = jnp.maximum(m_prev, jnp.max(s, axis=-1, keepdims=True))
    alpha = jnp.exp(m_prev - m_new)
    p = jnp.exp(s - m_new)                                   # (tq, ts)
    l_ref[0] = alpha * l_ref[0] + jnp.sum(p, axis=-1, keepdims=True)
    acc_ref[0] = alpha * acc_ref[0] + jnp.dot(
        p, v_ref[0], preferred_element_type=jnp.float32)
    m_ref[0] = m_new

    @pl.when(j == pl.num_programs(2) - 1)
    def _():
        # dropout(p=0.0) == identity.  approx=True would break 1e-5 tolerance.
        o_ref[0] = (acc_ref[0] *
                    pl.reciprocal(l_ref[0], approx=False)).astype(o_ref.dtype)


def pallas_flash_attention(q, k, v, *, scale, tq=256, ts=512):
    """Head-major flash attention.

    q: (bsz*heads, tgt, d), k/v: (bsz*heads, src, d) -> (bsz*heads, tgt, d).
    VMEM is bounded by the (tq, d)/(ts, d) tiles + (tq, ts) scores regardless
    of sequence length; tq<=256 / ts<=512 fits comfortably in v7x's 64 MiB.
    """
    bh, tgt, d = q.shape
    src = k.shape[1]
    tq = _pick_tile(tgt, tq, 8)
    ts = _pick_tile(src, ts, 8)
    grid = (bh, tgt // tq, src // ts)
    return pl.pallas_call(
        functools.partial(_flash_attn_kernel, scale=scale),
        out_shape=jax.ShapeDtypeStruct((bh, tgt, d), jnp.float32),
        grid_spec=pltpu.PrefetchScalarGridSpec(
            num_scalar_prefetch=0,
            grid=grid,
            in_specs=[
                pl.BlockSpec((1, tq, d), lambda b, i, j: (b, i, 0)),
                pl.BlockSpec((1, ts, d), lambda b, i, j: (b, j, 0)),
                pl.BlockSpec((1, ts, d), lambda b, i, j: (b, j, 0)),
            ],
            out_specs=pl.BlockSpec((1, tq, d), lambda b, i, j: (b, i, 0)),
            scratch_shapes=[
                pltpu.VMEM((1, tq, 1), jnp.float32),   # running max
                pltpu.VMEM((1, tq, 1), jnp.float32),   # running denom
                pltpu.VMEM((1, tq, d), jnp.float32),   # f32 accumulator
            ],
        ),
        compiler_params=pltpu.CompilerParams(
            dimension_semantics=("parallel", "parallel", "arbitrary"),
            vmem_limit_bytes=_VMEM_LIMIT),
    )(q, k, v)


# ----------------------------- module wrapper -----------------------------

def fuse_qkv_params(params):
    """Precompute the fused QKV projection weight/bias once (not per call)."""
    return {
        "in_w": jnp.concatenate(
            [params["q_w"], params["k_w"], params["v_w"]], axis=0),
        "in_b": jnp.concatenate(
            [params["q_b"], params["k_b"], params["v_b"]], axis=0),
    }


def _split_heads(x2d, bsz, seq, num_heads, head_dim):
    """(bsz*seq, E) -> (bsz*heads, seq, head_dim), one XLA transpose (matches
    the reference's view+transpose); keeps the kernel free of lane slicing."""
    return (x2d.reshape(bsz, seq, num_heads, head_dim)
               .transpose(0, 2, 1, 3)
               .reshape(bsz * num_heads, seq, head_dim))


def multihead_attention_forward(query, key, value, params, num_heads):
    """MultiheadAttention.forward (no masks; returns attn_output only)."""
    tgt_len, bsz, embed_dim = query.shape
    src_len = key.shape[0]
    head_dim = embed_dim // num_heads
    scaling = float(head_dim) ** (-0.5)

    self_attn = (query is key) and (key is value)

    # Batch-leading layout (single cheap transpose per distinct input tensor).
    xq = jnp.transpose(query, (1, 0, 2)).reshape(bsz * tgt_len, embed_dim)

    if self_attn:
        # Fused QKV projection: one (3E, E) matmul; read x from HBM once.
        if "in_w" in params:
            w_in, b_in = params["in_w"], params["in_b"]
        else:
            w_in = jnp.concatenate(
                [params["q_w"], params["k_w"], params["v_w"]], axis=0)
            b_in = jnp.concatenate(
                [params["q_b"], params["k_b"], params["v_b"]], axis=0)
        qkv = pallas_linear(xq, w_in, b_in)                  # (bsz*tgt, 3E)
        q2d = qkv[:, :embed_dim]
        k2d = qkv[:, embed_dim:2 * embed_dim]
        v2d = qkv[:, 2 * embed_dim:]
        src_eff = tgt_len
    else:
        xk = jnp.transpose(key, (1, 0, 2)).reshape(bsz * src_len, embed_dim)
        xv = xk if value is key else jnp.transpose(
            value, (1, 0, 2)).reshape(bsz * src_len, embed_dim)
        q2d = pallas_linear(xq, params["q_w"], params["q_b"])
        k2d = pallas_linear(xk, params["k_w"], params["k_b"])
        v2d = pallas_linear(xv, params["v_w"], params["v_b"])
        src_eff = src_len

    # Head-major split (bsz*heads, seq, head_dim) — done once in XLA so the
    # attention kernel's dot operands are contiguous tiles.
    q = _split_heads(q2d, bsz, tgt_len, num_heads, head_dim)
    k = _split_heads(k2d, bsz, src_eff, num_heads, head_dim)
    v = _split_heads(v2d, bsz, src_eff, num_heads, head_dim)

    attn = pallas_flash_attention(q, k, v, scale=scaling)    # (bsz*H, tgt, d)

    # Merge heads back to (bsz*tgt, E) (one XLA transpose), then out proj.
    attn2d = (attn.reshape(bsz, num_heads, tgt_len, head_dim)
                  .transpose(0, 2, 1, 3)
                  .reshape(bsz * tgt_len, embed_dim))
    out = pallas_linear(attn2d, params["out_w"], params["out_b"])
    out = out.reshape(bsz, tgt_len, embed_dim)
    return jnp.transpose(out, (1, 0, 2))                     # (tgt, bsz, E)


# ----------------------------- reference (pure JAX) -----------------------------

def reference_forward(query, key, value, params, num_heads):
    tgt_len, bsz, embed_dim = query.shape
    src_len = key.shape[0]
    head_dim = embed_dim // num_heads
    scaling = float(head_dim) ** (-0.5)

    def lin(x, w, b):
        return x @ w.T + b

    q = lin(query, params["q_w"], params["q_b"]) * scaling
    k = lin(key, params["k_w"], params["k_b"])
    v = lin(value, params["v_w"], params["v_b"])
    q = q.reshape(tgt_len, bsz * num_heads, head_dim).transpose(1, 0, 2)
    k = k.reshape(src_len, bsz * num_heads, head_dim).transpose(1, 0, 2)
    v = v.reshape(src_len, bsz * num_heads, head_dim).transpose(1, 0, 2)
    s = jnp.einsum("bid,bjd->bij", q, k)
    p = jax.nn.softmax(s, axis=-1)
    o = jnp.einsum("bij,bjd->bid", p, v)
    o = o.transpose(1, 0, 2).reshape(tgt_len, bsz, embed_dim)
    return lin(o, params["out_w"], params["out_b"])


# ----------------------------- parameter init -----------------------------

def init_params(key, embed_dim):
    # Mimics nn.Linear default init: U(-1/sqrt(fan_in), 1/sqrt(fan_in)).
    bound = 1.0 / (embed_dim ** 0.5)
    keys = jax.random.split(key, 8)

    def u(k, shape):
        return jax.random.uniform(k, shape, jnp.float32, -bound, bound)

    return {
        "q_w": u(keys[0], (embed_dim, embed_dim)), "q_b": u(keys[1], (embed_dim,)),
        "k_w": u(keys[2], (embed_dim, embed_dim)), "k_b": u(keys[3], (embed_dim,)),
        "v_w": u(keys[4], (embed_dim, embed_dim)), "v_b": u(keys[5], (embed_dim,)),
        "out_w": u(keys[6], (embed_dim, embed_dim)), "out_b": u(keys[7], (embed_dim,)),
    }


# ----------------------------- main -----------------------------

if __name__ == "__main__":
    embed_dim = 32
    num_heads = 4
    seq_len = 8
    bsz = 2

    root = jax.random.PRNGKey(0)
    k_params, k_x, k_k, k_v = jax.random.split(root, 4)
    params = init_params(k_params, embed_dim)
    # Precompute the fused QKV weights ONCE (outside the forward pass).
    params = dict(params, **fuse_qkv_params(params))

    # Self-attention (fused QKV projection path).
    x = jax.random.normal(k_x, (seq_len, bsz, embed_dim), jnp.float32)
    out_self = multihead_attention_forward(x, x, x, params, num_heads)
    out_self = jax.block_until_ready(out_self)
    ref_self = reference_forward(x, x, x, params, num_heads)
    assert out_self.shape == (seq_len, bsz, embed_dim)
    assert jnp.allclose(out_self, ref_self, atol=1e-5, rtol=1e-5), \
        "self-attention mismatch vs reference"

    # Cross-attention (separate projection path).
    key_in = jax.random.normal(k_k, (seq_len, bsz, embed_dim), jnp.float32)
    value_in = jax.random.normal(k_v, (seq_len, bsz, embed_dim), jnp.float32)
    out_x = multihead_attention_forward(x, key_in, value_in, params, num_heads)
    out_x = jax.block_until_ready(out_x)
    ref_x = reference_forward(x, key_in, value_in, params, num_heads)
    assert jnp.allclose(out_x, ref_x, atol=1e-5, rtol=1e-5), \
        "cross-attention mismatch vs reference"

    print("KERNEL_OK")
</pallas_src>

<mosaic_0001>
module attributes {stable_mosaic.version = 11 : i64} {
  func.func @_linear_kernel(%arg0: i32, %arg1: i32, %arg2: i32, %arg3: memref<16x32xf32, #tpu.memory_space<vmem>>, %arg4: memref<96x32xf32, #tpu.memory_space<vmem>>, %arg5: memref<1x96xf32, #tpu.memory_space<vmem>>, %arg6: memref<16x96xf32, #tpu.memory_space<vmem>>, %arg7: memref<16x96xf32, #tpu.memory_space<vmem>>) attributes {dimension_semantics = [#tpu.dimension_semantics<parallel>, #tpu.dimension_semantics<parallel>, #tpu.dimension_semantics<arbitrary>], iteration_bounds = array<i64: 1, 1, 1>, scalar_prefetch = 0 : i64, scratch_operands = 1 : i64, tpu.core_type = #tpu.core_type<tc>, window_params = [{transform_indices = @transform_0, window_bounds = array<i64: 16, 32>}, {transform_indices = @transform_1, window_bounds = array<i64: 96, 32>}, {transform_indices = @transform_2, window_bounds = array<i64: 1, 96>}, {transform_indices = @transform_3, window_bounds = array<i64: 16, 96>}]} {
    %c0_i32 = arith.constant 0 : i32
    %0 = arith.cmpi eq, %arg2, %c0_i32 : i32
    %1 = arith.extui %0 : i1 to i32
    %c0_i32_0 = arith.constant 0 : i32
    %2 = arith.cmpi ne, %1, %c0_i32_0 : i32
    scf.if %2 {
      %cst_10 = arith.constant 0.000000e+00 : f32
      %12 = vector.broadcast %cst_10 : f32 to vector<16x96xf32>
      %c0_11 = arith.constant 0 : index
      %c0_12 = arith.constant 0 : index
      %13 = vector.load %arg7[%c0_11, %c0_12] : memref<16x96xf32, #tpu.memory_space<vmem>>, vector<16x96xf32>
      tpu.vector_store %arg7[%c0_11, %c0_12], %12 {strides = array<i32>} : memref<16x96xf32, #tpu.memory_space<vmem>>, vector<16x96xf32>,
    } else {
    }
    %c0 = arith.constant 0 : index
    %c0_1 = arith.constant 0 : index
    %3 = vector.load %arg7[%c0, %c0_1] : memref<16x96xf32, #tpu.memory_space<vmem>>, vector<16x96xf32>
    %c0_2 = arith.constant 0 : index
    %c0_3 = arith.constant 0 : index
    %4 = vector.load %arg3[%c0_2, %c0_3] : memref<16x32xf32, #tpu.memory_space<vmem>>, vector<16x32xf32>
    %c0_4 = arith.constant 0 : index
    %c0_5 = arith.constant 0 : index
    %5 = vector.load %arg4[%c0_4, %c0_5] : memref<96x32xf32, #tpu.memory_space<vmem>>, vector<96x32xf32>
    %cst = arith.constant dense<0.000000e+00> : vector<16x96xf32>
    %6 = tpu.matmul %4, %5, %cst {dimension_numbers = #tpu.dot_dimension_numbers<[1], [1], [0], [0], [0, 0, 1, 0], [], []>} : vector<16x32xf32>, vector<96x32xf32>, vector<16x96xf32> -> vector<16x96xf32>
    %7 = arith.addf %3, %6 : vector<16x96xf32>
    %c0_6 = arith.constant 0 : index
    %c0_7 = arith.constant 0 : index
    %8 = vector.load %arg7[%c0_6, %c0_7] : memref<16x96xf32, #tpu.memory_space<vmem>>, vector<16x96xf32>
    tpu.vector_store %arg7[%c0_6, %c0_7], %7 {strides = array<i32>} : memref<16x96xf32, #tpu.memory_space<vmem>>, vector<16x96xf32>,
    %c0_i32_8 = arith.constant 0 : i32
    %9 = arith.cmpi eq, %arg2, %c0_i32_8 : i32
    %10 = arith.extui %9 : i1 to i32
    %c0_i32_9 = arith.constant 0 : i32
    %11 = arith.cmpi ne, %10, %c0_i32_9 : i32
    scf.if %11 {
      %c0_10 = arith.constant 0 : index
      %c0_11 = arith.constant 0 : index
      %12 = vector.load %arg7[%c0_10, %c0_11] : memref<16x96xf32, #tpu.memory_space<vmem>>, vector<16x96xf32>
      %c0_12 = arith.constant 0 : index
      %c0_13 = arith.constant 0 : index
      %13 = vector.load %arg5[%c0_12, %c0_13] : memref<1x96xf32, #tpu.memory_space<vmem>>, vector<1x96xf32>
      %14 = vector.broadcast %13 : vector<1x96xf32> to vector<16x96xf32>
      %15 = arith.addf %12, %14 : vector<16x96xf32>
      %c0_14 = arith.constant 0 : index
      %c0_15 = arith.constant 0 : index
      %16 = vector.load %arg6[%c0_14, %c0_15] : memref<16x96xf32, #tpu.memory_space<vmem>>, vector<16x96xf32>
      tpu.vector_store %arg6[%c0_14, %c0_15], %15 {strides = array<i32>} : memref<16x96xf32, #tpu.memory_space<vmem>>, vector<16x96xf32>,
    } else {
    }
    return
  }
  func.func @transform_0(%arg0: i32, %arg1: i32, %arg2: i32) -> (i32, i32) {
    %c0_i32 = arith.constant 0 : i32
    return %arg0, %arg2 : i32, i32
  }
  func.func @transform_1(%arg0: i32, %arg1: i32, %arg2: i32) -> (i32, i32) {
    %c0_i32 = arith.constant 0 : i32
    return %arg1, %arg2 : i32, i32
  }
  func.func @transform_2(%arg0: i32, %arg1: i32, %arg2: i32) -> (i32, i32) {
    %c0_i32 = arith.constant 0 : i32
    %c0_i32_0 = arith.constant 0 : i32
    return %c0_i32, %arg1 : i32, i32
  }
  func.func @transform_3(%arg0: i32, %arg1: i32, %arg2: i32) -> (i32, i32) {
    %c0_i32 = arith.constant 0 : i32
    return %arg0, %arg1 : i32, i32
  }
}

</mosaic_0001>

<bundles_post_ra>
// kernel: tpu_custom_call.1
= control target key start
LH: loop header
LB: loop body
LE: loop exit
PB: predicated region body
PF: predicated region fallthrough
CT: control target
= control target key end

     0   :  { %vm38_vm0 = vcmask 261120   ;;  %vm19_vm1 = vcmask 785408   ;;  %v313_v6 = vmov 0.0   ;;  %s432_s0 = inlined_call_operand.vmem [shape: f32[16,32], index: 0, kind: input, shape index: {}]   ;;  %s433_s1 = inlined_call_operand.vmem [shape: f32[96,32], index: 1, kind: input, shape index: {}]   ;;  %s434_s2 = inlined_call_operand.vmem [shape: f32[1,96], index: 2, kind: input, shape index: {}]   ;;  %s435_s3 = inlined_call_operand.hbm [shape: f32[16,96], index: 3, kind: output, shape index: {}]  }
   0x1   :  { %v26_v0 = vld [vmem:[%s433_s1] sm:$0xff]  ;;  %v27_v1 = vld [vmem:[%s433_s1 + $0x8] sm:$0xff]  ;;  %v28_v2 = vld [vmem:[%s433_s1 + $0x10] sm:$0xff]  ;;  %21 = vst.msk [vmem:[#allocation2 + $0x8] sm:$0xff] %vm19_vm1, %v313_v6 }
   0x2   :  { %v249_v3 = vpack.c.bf16 %v27_v1, %v26_v0  ;;  %vm348_vm2 = vmpackc.low %vm38_vm0, %vm38_vm0  ;;  %v29_v5 = vld [vmem:[%s433_s1 + $0x18] sm:$0xff]  ;;  %20 = vst.msk [vmem:[#allocation2] sm:$0xff] %vm19_vm1, %v313_v6  ;;  %v24_v8 = vld [vmem:[%s432_s0] sm:$0xff] }
   0x3   :  { %v255_v7 = vpack.c.bf16 %v29_v5, %v28_v2  ;;  %246 = vmatprep.mubr.msk.f32.mxu0 %vm38_vm0, %v24_v8 }
   0x4   :  { %251 = vmatprep.subr.msk.bf16.mxu0 %vm348_vm2, %v249_v3 }
   0x5   :  { %254 = vmatpush3.bf16.xpose.msk.msra.mxu0 %vm348_vm2, %v249_v3 }
   0x6   :  { %257 = vmatprep.subr.msk.bf16.mxu0 %vm348_vm2, %v255_v7 }
   0x7   :  { %8 = vsyncpa [#allocation4], 0  ;;  %v30_v9 = vld [vmem:[%s433_s1 + $0x20] sm:$0xff]  ;;  %v31_v10 = vld [vmem:[%s433_s1 + $0x28] sm:$0xff]  ;;  %s314_s14 = smov [#allocation3]  }
   0x8   :  { %v261_v11 = vpack.c.bf16 %v31_v10, %v30_v9  ;;  %v32_v12 = vld [vmem:[%s433_s1 + $0x30] sm:$0xff]  ;;  %v33_v13 = vld [vmem:[%s433_s1 + $0x38] sm:$0xff]  ;;  %v34_v15 = vld [vmem:[%s433_s1 + $0x40] sm:$0xff]  ;;  %s182_s15 = sshll.u32 %s314_s14, 4  ;;  %s183_s15 = int_to_ptr.vmem [resolvable:$true] %s182_s15 }
   0x9   :  { %v267_v14 = vpack.c.bf16 %v33_v13, %v32_v12  ;;  %v35_v16 = vld [vmem:[%s433_s1 + $0x48] sm:$0xff]  ;;  %v36_v18 = vld [vmem:[%s433_s1 + $0x50] sm:$0xff]  ;;  %v37_v19 = vld [vmem:[%s433_s1 + $0x58] sm:$0xff]  ;;  %p294_p1 = scmp.lt.s32.totalorder %s183_s15, %s183_s15 }
   0xa   :  { %v273_v17 = vpack.c.bf16 %v35_v16, %v34_v15  ;;  %v279_v20 = vpack.c.bf16 %v37_v19, %v36_v18  ;;  %v25_v21 = vld [vmem:[%s432_s0 + $0x8] sm:$0xff]  ;;  %v22_v23 = vld [vmem:[#allocation2] sm:$0xff]  ;;  %s289_s0 = scalar_lea.vmem %s183_s15, 256 }
   0xb   :  { %v23_v22 = vld [vmem:[#allocation2 + $0x8] sm:$0xff]  ;;  %v207_v28 = vld [vmem:[%s434_s2] ss:$0 sm:$0xff]  ;;  %p290_p0 = scmp.ne.s32.totalorder %s183_s15, %s289_s0  ;;  %p295_p2 = scmp.lt.s32.totalorder %s289_s0, %s289_s0 }
   0xd   :  { %260 = vmatpush3.bf16.xpose.msk.msra.mxu0 %vm348_vm2, %v255_v7  ;;  %p296_p3 = por %p295_p2, %p294_p1 }
   0xe   :  { %263 = vmatprep.subr.msk.bf16.mxu0 %vm348_vm2, %v261_v11 }
   0xf   :  { %p297_p4 = pnand %p296_p3, %p290_p0 }
  0x15   :  { %266 = vmatpush3.bf16.xpose.msk.msra.mxu0 %vm348_vm2, %v261_v11 }
  0x16   :  { %269 = vmatprep.subr.msk.bf16.mxu0 %vm348_vm2, %v267_v14 }
  0x1d   :  { %272 = vmatpush3.bf16.xpose.msk.msra.mxu0 %vm348_vm2, %v267_v14 }
  0x1e   :  { %275 = vmatprep.subr.msk.bf16.mxu0 %vm348_vm2, %v273_v17 }
  0x25   :  { %278 = vmatpush3.bf16.xpose.msk.msra.mxu0 %vm348_vm2, %v273_v17 }
  0x26   :  { %281 = vmatprep.subr.msk.bf16.mxu0 %vm348_vm2, %v279_v20 }
  0x2d   :  { %284 = vmatpush3.bf16.xpose.msk.msra.mxu0 %vm348_vm2, %v279_v20 }
  0x34   :  { %247 = vmatmul.mubr.msk.f32.vlgmr.msra.gmra.mrb[0].mxu0 %vm38_vm0, %v25_v21 }
 0x107   :  { %v248_v24 = vpop.f32.mrb[0].mxu0 }
 0x108   :  { %v157_v25 = vadd.f32 %v248_v24, %v23_v22  ;;  %v147_v26 = vpop.f32.mrb[1].mxu0 }
 0x109   :  { %v156_v27 = vadd.f32 %v147_v26, %v22_v23 }
 0x10a   :  { %160 = vst.msk [vmem:[#allocation2 + $0x8] sm:$0xff] %vm19_vm1, %v157_v25 }
 0x10b   :  { %159 = vst.msk [vmem:[#allocation2] sm:$0xff] %vm19_vm1, %v156_v27 }
 0x111   :  { %v165_v29 = vld [vmem:[#allocation2 + $0x8] sm:$0xff] }
 0x112   :  { %v164_v30 = vld [vmem:[#allocation2] sm:$0xff]  ;;  %v174_v31 = vadd.f32 %v207_v28, %v165_v29 }
 0x113   :  { %v173_v32 = vadd.f32 %v207_v28, %v164_v30 }
 0x114   :  { %176 = vst.msk [vmem:[#allocation3 + $0x8] sm:$0xff] %vm19_vm1, %v174_v31 }
 0x115   :  { %175 = vst.msk [vmem:[#allocation3] sm:$0xff] %vm19_vm1, %v173_v32 }
 0x116   :  { %300 = shalt.err (!%p297_p4)
}
 0x117   :  { %s301_s17 = scalar_lea.hbm %s435_s3, 256 }
 0x118   :  { %p302_p5 = scmp.ne.s32.totalorder %s435_s3, %s301_s17  ;;  %p305_p6 = scmp.lt.u32.totalorder %s301_s17, %s435_s3 }
 0x11a   :  { %p307_p7 = pnand %p305_p6, %p302_p5 }
 0x11c   :  { %310 = shalt.err (!%p307_p7)
}
 0x11d   :  { %s315_s22 = smov 128   ;;  %s316_s23 = smov 8  }
 0x11e   :  { %188 = dma.vmem_to_hbm [thread:$0]  %s183_s15, 256, %s435_s3, [#allocation4], %s315_s22, %s315_s22, %s316_s23  }
 0x11f   :  { %311 = dma.done.wait [#allocation4], 256  }
 0x120   :  { %312 = vsyncadd [#allocation4], 4294967040 }
 0x121   :  { %192 = vsyncpa [#allocation4], 1 }

</bundles_post_ra>
